<compile_context>
chip_gen: v5e
topology: v5e:2x2
jax: 0.10.0
libtpu: 0.0.40
codegen_flags: <defaults>
</compile_context>

<pallas_src>
import math

import jax
import jax.numpy as jnp
from jax.experimental import pallas as pl
from jax.experimental.pallas import tpu as pltpu


_VMEM_LIMIT_BYTES = 48 * 1024 * 1024  # headroom, still < v7x 64 MiB physical


def _pick_tm(m, tm_max=512):
    """Largest row tile <= tm_max (>=128) that still gives >= 2 grid steps."""
    tm = tm_max
    while tm > 128 and -(-m // tm) < 2:
        tm //= 2
    return tm


# --------------- Kernel 1: conv matmul + fused per-tile BN statistics ----------


def _conv_stats_kernel(p_ref, w_ref, o_ref, psum_ref, psq_ref):
    # p_ref: (tm, K) bf16 im2col patches tile, w_ref: (K, Cp) bf16 weights,
    # o_ref: (tm, Cp) bf16 conv output tile,
    # psum_ref/psq_ref: (1, 1, Cp) f32 per-tile partial sum / sum-of-squares.
    acc = jnp.dot(p_ref[...], w_ref[...], preferred_element_type=jnp.float32)
    y_bf = acc.astype(jnp.bfloat16)
    o_ref[...] = y_bf
    # Statistics are taken over the bf16-rounded values that are actually
    # stored, so pass 2's normalization matches its input exactly.
    # Padded (zero) rows/channels contribute exactly 0 to both partials.
    yf = y_bf.astype(jnp.float32)
    psum_ref[...] = jnp.sum(yf, axis=0, keepdims=True)[None, :, :]
    psq_ref[...] = jnp.sum(yf * yf, axis=0, keepdims=True)[None, :, :]


def conv_matmul_with_stats(patches, w_mat, *, tm):
    """patches: (Mpad, K) bf16, w_mat: (K, Cp) bf16 ->
    (conv_out (Mpad, Cp) bf16, psum (nt, 1, Cp) f32, psumsq (nt, 1, Cp) f32)."""
    Mpad, K = patches.shape
    Cp = w_mat.shape[1]
    assert Mpad % tm == 0 and Cp % 128 == 0
    n_tiles = Mpad // tm
    # TODO(synk): for very large K (>~8k) or Cout (>~2k) add K/Cout grid axes
    # with an f32 VMEM accumulator instead of full-K / full-Cout blocks.
    return pl.pallas_call(
        _conv_stats_kernel,
        out_shape=(
            jax.ShapeDtypeStruct((Mpad, Cp), jnp.bfloat16),
            jax.ShapeDtypeStruct((n_tiles, 1, Cp), jnp.float32),
            jax.ShapeDtypeStruct((n_tiles, 1, Cp), jnp.float32),
        ),
        grid_spec=pltpu.PrefetchScalarGridSpec(
            num_scalar_prefetch=0,
            grid=(n_tiles,),
            in_specs=[
                pl.BlockSpec((tm, K), lambda i: (i, 0)),
                pl.BlockSpec((K, Cp), lambda i: (0, 0)),
            ],
            out_specs=[
                pl.BlockSpec((tm, Cp), lambda i: (i, 0)),
                pl.BlockSpec((1, 1, Cp), lambda i: (i, 0, 0)),
                pl.BlockSpec((1, 1, Cp), lambda i: (i, 0, 0)),
            ],
        ),
        compiler_params=pltpu.CompilerParams(
            dimension_semantics=("parallel",),
            vmem_limit_bytes=_VMEM_LIMIT_BYTES,
        ),
    )(patches, w_mat)


# ------------------- Kernel 2: tiled BN normalize (affine) + ReLU --------------


def _bn_relu_kernel(y_ref, scale_ref, shift_ref, o_ref):
    # y_ref: (tm, Cp) bf16 conv tile; scale/shift: (1, Cp) f32 per-channel.
    y = y_ref[...].astype(jnp.float32)
    out = y * scale_ref[...] + shift_ref[...]
    o_ref[...] = jnp.maximum(out, 0.0).astype(o_ref.dtype)


def bn_relu_normalize(y, scale, shift, *, tm):
    """y: (Mpad, Cp) bf16, scale/shift: (1, Cp) f32 -> (Mpad, Cp) f32."""
    Mpad, Cp = y.shape
    assert Mpad % tm == 0
    n_tiles = Mpad // tm
    return pl.pallas_call(
        _bn_relu_kernel,
        out_shape=jax.ShapeDtypeStruct((Mpad, Cp), jnp.float32),
        grid_spec=pltpu.PrefetchScalarGridSpec(
            num_scalar_prefetch=0,
            grid=(n_tiles,),
            in_specs=[
                # mem-bound pass with trivial compute: deepen input buffering.
                pl.BlockSpec((tm, Cp), lambda i: (i, 0),
                             pipeline_mode=pl.Buffered(3)),
                pl.BlockSpec((1, Cp), lambda i: (0, 0)),
                pl.BlockSpec((1, Cp), lambda i: (0, 0)),
            ],
            out_specs=pl.BlockSpec((tm, Cp), lambda i: (i, 0)),
        ),
        compiler_params=pltpu.CompilerParams(
            dimension_semantics=("parallel",),
            vmem_limit_bytes=_VMEM_LIMIT_BYTES,
        ),
    )(y, scale, shift)


# ------------------------------ Module wrapper --------------------------------


def bn_conv2d_forward(
    x_nchw,
    weight,          # (Cout, Cin, KH, KW)
    gamma,           # (Cout,)
    beta,            # (Cout,)
    *,
    stride=(1, 1),
    padding=(1, 1),
    dilation=(1, 1),
    eps=1e-5,
    tm=None,
):
    # TODO(synk): groups != 1 not implemented (module default groups=1).
    # TODO(synk): running_mean/running_var updates of nn.BatchNorm2d are not
    #             produced (forward output itself matches training-mode BN).
    N, Cin, H, W = x_nchw.shape
    Cout, Cin_w, KH, KW = weight.shape
    assert Cin == Cin_w
    sh, sw = stride
    ph, pw = padding
    dh, dw = dilation

    OH = (H + 2 * ph - dh * (KH - 1) - 1) // sh + 1
    OW = (W + 2 * pw - dw * (KW - 1) - 1) // sw + 1
    M = N * OH * OW
    K = KH * KW * Cin

    if tm is None:
        tm = _pick_tm(M)
    Mpad = math.ceil(M / tm) * tm
    Cp = math.ceil(Cout / 128) * 128        # lane-dense output channels

    # --- glue: im2col in bf16 NHWC (K ordering is (kh, kw, cin)) ---
    # TODO(synk): move im2col inside the Pallas kernel (grid over (kh, kw) with
    #             a sliding index_map) to avoid the KH*KW HBM expansion.
    x_nhwc = jnp.transpose(x_nchw, (0, 2, 3, 1)).astype(jnp.bfloat16)
    xp = jnp.pad(x_nhwc, ((0, 0), (ph, ph), (pw, pw), (0, 0)))
    cols = []
    for kh in range(KH):
        for kw in range(KW):
            h0 = kh * dh
            w0 = kw * dw
            cols.append(
                xp[:, h0: h0 + (OH - 1) * sh + 1: sh,
                      w0: w0 + (OW - 1) * sw + 1: sw, :]
            )
    patches = jnp.concatenate(cols, axis=-1).reshape(M, K)
    if Mpad != M:
        patches = jnp.pad(patches, ((0, Mpad - M), (0, 0)))  # zero rows

    # weight (Cout, Cin, KH, KW) -> (KH, KW, Cin, Cout) -> (K, Cout) -> pad Cout
    w_mat = jnp.transpose(weight, (2, 3, 1, 0)).reshape(K, Cout)
    w_mat = w_mat.astype(jnp.bfloat16)
    if Cp != Cout:
        w_mat = jnp.pad(w_mat, ((0, 0), (0, Cp - Cout)))      # zero channels

    # --- Pallas hot path 1: conv matmul + fused partial BN stats ---
    conv_out, psum, psq = conv_matmul_with_stats(patches, w_mat, tm=tm)

    # --- tiny per-channel reduction of partial stats (O(n_tiles * Cp)) ---
    sum_c = jnp.sum(psum, axis=(0, 1))                     # (Cp,)
    sumsq_c = jnp.sum(psq, axis=(0, 1))                    # (Cp,)
    mean = sum_c / M                                       # true M, not Mpad
    var = jnp.maximum(sumsq_c / M - mean * mean, 0.0)      # biased (training BN)
    inv_std = jax.lax.rsqrt(var + eps)
    gamma_p = jnp.pad(gamma.astype(jnp.float32), (0, Cp - Cout))
    beta_p = jnp.pad(beta.astype(jnp.float32), (0, Cp - Cout))
    scale = (gamma_p * inv_std).reshape(1, Cp)
    shift = (beta_p - mean * gamma_p * inv_std).reshape(1, Cp)

    # --- Pallas hot path 2: tiled normalize + ReLU ---
    out = bn_relu_normalize(conv_out, scale, shift, tm=tm)

    # strip padding, back to NCHW
    out = out[:M, :Cout].reshape(N, OH, OW, Cout)
    return jnp.transpose(out, (0, 3, 1, 2))


# ----------------------------------- main --------------------------------------

if __name__ == "__main__":
    key = jax.random.PRNGKey(0)
    k_x, k_w = jax.random.split(key)

    # Small shapes: batch=2, in_channels=4, spatial=16x16, out_channels=8, 3x3.
    N, Cin, H, W = 2, 4, 16, 16
    Cout, KH, KW = 8, 3, 3

    x = jax.random.normal(k_x, (N, Cin, H, W), dtype=jnp.float32)
    weight = jax.random.normal(k_w, (Cout, Cin, KH, KW), dtype=jnp.float32) * 0.1
    gamma = jnp.ones((Cout,), dtype=jnp.float32)   # BatchNorm2d default weight
    beta = jnp.zeros((Cout,), dtype=jnp.float32)   # BatchNorm2d default bias

    y = bn_conv2d_forward(
        x, weight, gamma, beta,
        stride=(1, 1), padding=(1, 1), dilation=(1, 1),
    )
    y = jax.block_until_ready(y)
    assert y.shape == (N, Cout, H, W), y.shape
    assert bool(jnp.all(jnp.isfinite(y))), "non-finite output"

    # Pure-JAX reference (conv in bf16 with f32 accum, BN training stats, ReLU).
    ref_conv = jax.lax.conv_general_dilated(
        x.astype(jnp.bfloat16), weight.astype(jnp.bfloat16),
        window_strides=(1, 1), padding=((1, 1), (1, 1)),
        rhs_dilation=(1, 1),
        dimension_numbers=("NCHW", "OIHW", "NCHW"),
        preferred_element_type=jnp.float32,
    )
    mu = ref_conv.mean(axis=(0, 2, 3), keepdims=True)
    var = ref_conv.var(axis=(0, 2, 3), keepdims=True)
    ref = (ref_conv - mu) * jax.lax.rsqrt(var + 1e-5)
    ref = ref * gamma.reshape(1, -1, 1, 1) + beta.reshape(1, -1, 1, 1)
    ref = jnp.maximum(ref, 0.0)
    max_err = float(jnp.max(jnp.abs(y - ref)))
    assert max_err < 0.1, f"mismatch vs reference: max_err={max_err}"

    print("KERNEL_OK")
</pallas_src>

<mosaic_0001>
module attributes {stable_mosaic.version = 11 : i64} {
  func.func @_conv_stats_kernel(%arg0: i32, %arg1: memref<256x36xbf16, #tpu.memory_space<vmem>>, %arg2: memref<36x128xbf16, #tpu.memory_space<vmem>>, %arg3: memref<256x128xbf16, #tpu.memory_space<vmem>>, %arg4: memref<1x1x128xf32, #tpu.memory_space<vmem>>, %arg5: memref<1x1x128xf32, #tpu.memory_space<vmem>>) attributes {dimension_semantics = [#tpu.dimension_semantics<parallel>], iteration_bounds = array<i64: 2>, scalar_prefetch = 0 : i64, scratch_operands = 0 : i64, tpu.core_type = #tpu.core_type<tc>, window_params = [{transform_indices = @transform_0, window_bounds = array<i64: 256, 36>}, {pipeline_mode = #tpu.pipeline_mode<synchronous>, transform_indices = @transform_1, window_bounds = array<i64: 36, 128>}, {transform_indices = @transform_2, window_bounds = array<i64: 256, 128>}, {transform_indices = @transform_3, window_bounds = array<i64: 1, 1, 128>}, {transform_indices = @transform_4, window_bounds = array<i64: 1, 1, 128>}]} {
    %c0 = arith.constant 0 : index
    %c0_0 = arith.constant 0 : index
    %0 = vector.load %arg1[%c0, %c0_0] : memref<256x36xbf16, #tpu.memory_space<vmem>>, vector<256x36xbf16>
    %c0_1 = arith.constant 0 : index
    %c0_2 = arith.constant 0 : index
    %1 = vector.load %arg2[%c0_1, %c0_2] : memref<36x128xbf16, #tpu.memory_space<vmem>>, vector<36x128xbf16>
    %cst = arith.constant dense<0.000000e+00> : vector<256x128xf32>
    %2 = tpu.matmul %0, %1, %cst {dimension_numbers = #tpu.dot_dimension_numbers<[1], [0], [0], [1], [0, 0, 1, 1], [], []>} : vector<256x36xbf16>, vector<36x128xbf16>, vector<256x128xf32> -> vector<256x128xf32>
    %3 = arith.truncf %2 : vector<256x128xf32> to vector<256x128xbf16>
    %c0_3 = arith.constant 0 : index
    %c0_4 = arith.constant 0 : index
    %4 = vector.load %arg3[%c0_3, %c0_4] : memref<256x128xbf16, #tpu.memory_space<vmem>>, vector<256x128xbf16>
    tpu.vector_store %arg3[%c0_3, %c0_4], %3 {strides = array<i32>} : memref<256x128xbf16, #tpu.memory_space<vmem>>, vector<256x128xbf16>,
    %5 = arith.extf %3 : vector<256x128xbf16> to vector<256x128xf32>
    %cst_5 = arith.constant dense<0.000000e+00> : vector<128xf32>
    %6 = vector.multi_reduction <add>, %5, %cst_5 [0] : vector<256x128xf32> to vector<128xf32>
    %7 = vector.shape_cast %6 : vector<128xf32> to vector<1x128xf32>
    %8 = vector.shape_cast %7 : vector<1x128xf32> to vector<1x1x128xf32>
    %c0_6 = arith.constant 0 : index
    %c0_7 = arith.constant 0 : index
    %c0_8 = arith.constant 0 : index
    %9 = vector.load %arg4[%c0_6, %c0_7, %c0_8] : memref<1x1x128xf32, #tpu.memory_space<vmem>>, vector<1x1x128xf32>
    tpu.vector_store %arg4[%c0_6, %c0_7, %c0_8], %8 {strides = array<i32>} : memref<1x1x128xf32, #tpu.memory_space<vmem>>, vector<1x1x128xf32>,
    %10 = arith.mulf %5, %5 : vector<256x128xf32>
    %cst_9 = arith.constant dense<0.000000e+00> : vector<128xf32>
    %11 = vector.multi_reduction <add>, %10, %cst_9 [0] : vector<256x128xf32> to vector<128xf32>
    %12 = vector.shape_cast %11 : vector<128xf32> to vector<1x128xf32>
    %13 = vector.shape_cast %12 : vector<1x128xf32> to vector<1x1x128xf32>
    %c0_10 = arith.constant 0 : index
    %c0_11 = arith.constant 0 : index
    %c0_12 = arith.constant 0 : index
    %14 = vector.load %arg5[%c0_10, %c0_11, %c0_12] : memref<1x1x128xf32, #tpu.memory_space<vmem>>, vector<1x1x128xf32>
    tpu.vector_store %arg5[%c0_10, %c0_11, %c0_12], %13 {strides = array<i32>} : memref<1x1x128xf32, #tpu.memory_space<vmem>>, vector<1x1x128xf32>,
    return
  }
  func.func @transform_0(%arg0: i32) -> (i32, i32) {
    %c0_i32 = arith.constant 0 : i32
    %c0_i32_0 = arith.constant 0 : i32
    return %arg0, %c0_i32 : i32, i32
  }
  func.func @transform_1(%arg0: i32) -> (i32, i32) {
    %c0_i32 = arith.constant 0 : i32
    %c0_i32_0 = arith.constant 0 : i32
    %c0_i32_1 = arith.constant 0 : i32
    return %c0_i32, %c0_i32_0 : i32, i32
  }
  func.func @transform_2(%arg0: i32) -> (i32, i32) {
    %c0_i32 = arith.constant 0 : i32
    %c0_i32_0 = arith.constant 0 : i32
    return %arg0, %c0_i32 : i32, i32
  }
  func.func @transform_3(%arg0: i32) -> (i32, i32, i32) {
    %c0_i32 = arith.constant 0 : i32
    %c0_i32_0 = arith.constant 0 : i32
    %c0_i32_1 = arith.constant 0 : i32
    return %arg0, %c0_i32, %c0_i32_0 : i32, i32, i32
  }
  func.func @transform_4(%arg0: i32) -> (i32, i32, i32) {
    %c0_i32 = arith.constant 0 : i32
    %c0_i32_0 = arith.constant 0 : i32
    %c0_i32_1 = arith.constant 0 : i32
    return %arg0, %c0_i32, %c0_i32_0 : i32, i32, i32
  }
}

</mosaic_0001>

<bundles_post_ra>
// kernel: tpu_custom_call.1
= control target key start
LH: loop header
LB: loop body
LE: loop exit
PB: predicated region body
PF: predicated region fallthrough
CT: control target
= control target key end

     0   :  { %10 = vsyncpa [#allocation3], 0  ;;  %s1614_s0 = inlined_call_operand.vmem [shape: bf16[512,36], index: 0, kind: input, shape index: {}]   ;;  %s1615_s1 = inlined_call_operand.vmem [shape: bf16[36,128], index: 1, kind: input, shape index: {}]   ;;  %s1616_s2 = inlined_call_operand.hbm [shape: bf16[512,128], index: 2, kind: output, shape index: {0}]   ;;  %s1617_s3 = inlined_call_operand.hbm [shape: f32[2,1,128], index: 3, kind: output, shape index: {1}]   ;;  %s1618_s4 = inlined_call_operand.hbm [shape: f32[2,1,128], index: 4, kind: output, shape index: {2}]  }
   0x1   :  { %12 = vsyncpa [#allocation3 + $0x1], 0 }
   0x2   :  { %13 = vsyncpa [#allocation5], 0 }
   0x3   :  { %15 = vsyncpa [#allocation5 + $0x1], 0  ;;  %s1284_s15 = smov 0   ;;  %s1286_s16 = smov 0  }
   0x4   :  { %s1288_s17 = smov 0   ;;  %s1290_s18 = smov 0  }
   0x5 LB: > { %s1305_s19 = sadd.s32 4294967295, %s1255_s18   ;;  %s859_s20 = sadd.s32 4294967294, %s1255_s18   ;;  %s1255_s18 = sphi %s1290_s18, %s1624_s18   ;;  %s1251_s17 = sphi %s1288_s17, %s1623_s17   ;;  %s1247_s16 = sphi %s1286_s16, %s1622_s16   ;;  %s1243_s15 = sphi %s1284_s15, %s1621_s15  }
   0x6   : > { %s1309_s21 = sadd.s32 1, %s1255_s18   ;;  %s75_s22 = sadd.s32 1, %s1251_s17 }
   0x7   : > { %s72_s23 = ssub.s32 %s1255_s18, %s1309_s21  ;;  %p85_p0 = scmp.ne.s32.totalorder %s1251_s17, %s1247_s16 }
   0x8   : > { %p73_p1 = scmp.eq.s32.totalorder %s72_s23, 0  ;;  %p86_p2 = scmp.eq.s32.totalorder %s1305_s19, 1 }
   0x9   : > { %p91_p3 = scmp.ne.s32.totalorder %s1247_s16, %s1243_s15  ;;  %p92_p4 = scmp.eq.s32.totalorder %s859_s20, 1 }
   0xa   : > { %s1322_s24 = scalar_select %p73_p1, %s1251_s17, %s75_s22  }
   0xb   : > { %p1324_p5 = por %p86_p2, %p85_p0  ;;  %p1328_p6 = por %p92_p4, %p91_p3 }
   0xc   : > { %p862_p7 = scmp.ge.s32.totalorder %s1255_s18, 1  ;;  %p174_p8 = scmp.lt.s32.totalorder %s1255_s18, 3 }
   0xe   : > { %p175_p9 = pnand %p862_p7, %p174_p8 }
   0xf   : > { %s864_s29 = sshll.u32 (!%p175_p9), %s1305_s19, 5  ;;  %s1384_s12 = sand.u32 (!%p175_p9), 1, %s1247_s16  }
  0x10   : > { %178 = sbr.rel (%p175_p9) target bundleno = 302 (0x12e), region = 28  ;;  %p209_p10 = scmp.lt.s32.totalorder (!%p175_p9), %s864_s29, 63 }
  0x11   : > { %s863_s13 = sshll.u32 (!%p175_p9), %s1384_s12, 7  ;;  %s977_s22 = sshll.u32 (!%p175_p9), %s1305_s19, 7 }
  0x12   : > { %s1395_s14 = scalar_lea.vmem (!%p175_p9), [#allocation2], %s863_s13  ;;  %s714_s28 = scalar_lea.hbm (!%p175_p9), %s1616_s2, %s977_s22 }
  0x13   : > { %s717_s30 = sshll.u32 (!%p175_p9), %s714_s28, 4  ;;  %s695_s5 = scalar_lea.sflag (!%p175_p9), [#allocation3], %s1384_s12  ;;  %s1490_s30 = int_to_ptr.hbm [resolvable:$true] %s717_s30 }
  0x14   : > { %s1153_s10 = scalar_lea.hbm (!%p175_p9), %s1616_s2, 256 }
  0x15   : > { %v252_v0 = vld [vmem:[%s1615_s1 + $0x10] sm:$0x3]  ;;  %vm397_vm0 = vcmask 1041408   ;;  %s1626_s29 = smov (!%p209_p10, %s864_s29), 63  ;;  %v976_v4 = vld [vmem:[%s1615_s1 + $0x8] sm:$0xff]  ;;  %v975_v5 = vld [vmem:[%s1615_s1] sm:$0xff] }
  0x16   : > { %v342_v1 = vunpack.c.l.b16 %v252_v0  ;;  %s865_s6 = sshll.u32 %s1626_s29, 2  ;;  %vm348_vm1 = vcmask 293888   ;;  %s715_s29 = sshll.u32 %s1395_s14, 4  ;;  %s1488_s29 = int_to_ptr.vmem [resolvable:$true] %s715_s29 }
  0x17   : > { %s1347_s11 = scalar_lea.vmem %s1614_s0, %s865_s6  ;;  %s1147_s6 = sshra.s32 %s1490_s30, 4  ;;  %s1148_s6 = int_to_ptr.hbm [resolvable:$true] %s1147_s6 }
  0x18   : > { %v345_v2 = vpack.c.b16 %v342_v1, %v342_v1  ;;  %v959_v6 = vld [vmem:[%s1347_s11] sm:$0xff]  ;;  %v960_v10 = vld [vmem:[%s1347_s11 + $0x8] sm:$0xff]  ;;  %v961_v14 = vld [vmem:[%s1347_s11 + $0x10] sm:$0xff]  ;;  %s1149_s7 = scalar_lea.hbm %s1148_s6, 128  ;;  %p1154_p0 = scmp.lt.s32.totalorder %s1148_s6, %s1616_s2 }
  0x19   : > { %v963_v7 = vld [vmem:[%s1347_s11 + $0x20] sm:$0xff]  ;;  %v964_v11 = vld [vmem:[%s1347_s11 + $0x28] sm:$0xff]  ;;  %v965_v15 = vld [vmem:[%s1347_s11 + $0x30] sm:$0xff]  ;;  %p1150_p11 = scmp.ne.s32.totalorder %s1148_s6, %s1149_s7  ;;  %p1155_p1 = scmp.lt.s32.totalorder %s1153_s10, %s1149_s7 }
  0x1a   : > { %v399_v3 = vsel %vm397_vm0, %v345_v2, 0  ;;  %v967_v8 = vld [vmem:[%s1347_s11 + $0x40] sm:$0xff]  ;;  %v968_v12 = vld [vmem:[%s1347_s11 + $0x48] sm:$0xff]  ;;  %v969_v16 = vld [vmem:[%s1347_s11 + $0x50] sm:$0xff] }
  0x1b   : > { %406 = vmatpush.bf16.msra.mxu0 %v399_v3  ;;  %1073 = vmatpush.bf16.msra.mxu1 %v399_v3  ;;  %v971_v9 = vld [vmem:[%s1347_s11 + $0x60] sm:$0xff]  ;;  %v972_v13 = vld [vmem:[%s1347_s11 + $0x68] sm:$0xff]  ;;  %v973_v17 = vld [vmem:[%s1347_s11 + $0x70] sm:$0xff]  ;;  %p1151_p12 = pnand %p1150_p11, %p1324_p5  ;;  %p1156_p2 = por %p1155_p1, %p1154_p0 }
  0x1c   : > { %1074 = vmatpush.bf16.msra.mxu2 %v399_v3  ;;  %1075 = vmatpush.bf16.msra.mxu3 %v399_v3  ;;  %v962_v18 = vld [vmem:[%s1347_s11 + $0x18] sm:$0xff] }
  0x1d   : > { %v966_v19 = vld [vmem:[%s1347_s11 + $0x38] sm:$0xff]  ;;  %p1152_p13 = pneg %p1151_p12 }
  0x1e   : > { %v970_v20 = vld [vmem:[%s1347_s11 + $0x58] sm:$0xff] }
  0x1f   : > { %407 = vmatpush.bf16.msra.mxu0 %v976_v4  ;;  %1076 = vmatpush.bf16.msra.mxu1 %v976_v4  ;;  %v974_v21 = vld [vmem:[%s1347_s11 + $0x78] sm:$0xff]  ;;  %p1157_p3 = pnand %p1156_p2, %p1152_p13 }
  0x20   : > { %1077 = vmatpush.bf16.msra.mxu2 %v976_v4  ;;  %1078 = vmatpush.bf16.msra.mxu3 %v976_v4 }
  0x23   : > { %408 = vmatpush.bf16.msra.mxu0 %v975_v5  ;;  %1079 = vmatpush.bf16.msra.mxu1 %v975_v5 }
  0x24   : > { %1080 = vmatpush.bf16.msra.mxu2 %v975_v5  ;;  %1081 = vmatpush.bf16.msra.mxu3 %v975_v5 }
  0x26   : > { %938 = vmatmul.msk.bf16.vlgmr.msra.gmra.mxu0 %vm348_vm1, %v959_v6  ;;  %942 = vmatmul.msk.bf16.vlgmr.msra.gmra.mxu1 %vm348_vm1, %v963_v7 }
  0x27   : > { %946 = vmatmul.msk.bf16.vlgmr.msra.gmra.mxu2 %vm348_vm1, %v967_v8  ;;  %950 = vmatmul.msk.bf16.vlgmr.msra.gmra.mxu3 %vm348_vm1, %v971_v9 }
  0x36   : > { %939 = vmatmul.msk.bf16.gmra.mxu0 %vm348_vm1, %v960_v10  ;;  %943 = vmatmul.msk.bf16.gmra.mxu1 %vm348_vm1, %v964_v11 }
  0x37   : > { %947 = vmatmul.msk.bf16.gmra.mxu2 %vm348_vm1, %v968_v12  ;;  %951 = vmatmul.msk.bf16.gmra.mxu3 %vm348_vm1, %v972_v13 }
  0x46   : > { %940 = vmatmul.msk.bf16.gmra.mxu0 %vm348_vm1, %v961_v14  ;;  %944 = vmatmul.msk.bf16.gmra.mxu1 %vm348_vm1, %v965_v15 }
  0x47   : > { %948 = vmatmul.msk.bf16.gmra.mxu2 %vm348_vm1, %v969_v16  ;;  %952 = vmatmul.msk.bf16.gmra.mxu3 %vm348_vm1, %v973_v17 }
  0x56   : > { %941 = vmatmul.msk.bf16.gmra.mxu0 %vm348_vm1, %v962_v18  ;;  %945 = vmatmul.msk.bf16.gmra.mxu1 %vm348_vm1, %v966_v19 }
  0x57   : > { %949 = vmatmul.msk.bf16.gmra.mxu2 %vm348_vm1, %v970_v20  ;;  %953 = vmatmul.msk.bf16.gmra.mxu3 %vm348_vm1, %v974_v21 }
  0xa3   : > { %v410_v22 = vpop.f32.mrf.mxu0  ;;  %v1381_v23 = vpop.f32.mrf.mxu1 }
  0xa4   : > { %v490_v49 = vpack.c.bf16 %v410_v22, %v410_v22 }
  0xa6   : > { %v554_v59 = vunpack.c.l.bf16 %v490_v49 }
  0xa8   : > { %v624_v0 = vmul.f32 %v554_v59, %v554_v59 }
  0xaa   : > { %v1387_v24 = vpop.f32.mrf.mxu2  ;;  %v1393_v29 = vpop.f32.mrf.mxu3 }
  0xab   : > { %v412_v25 = vpop.f32.mrf.mxu0  ;;  %v1389_v26 = vpop.f32.mrf.mxu1 }
  0xac   : > { %v981_v27 = vpack.c.bf16 %v412_v25, %v410_v22  ;;  %v1001_v28 = vpack.c.bf16 %v1389_v26, %v1381_v23  ;;  %v491_v48 = vpack.c.bf16 %v412_v25, %v412_v25  ;;  %v498_v22 = vpack.c.bf16 %v1381_v23, %v1381_v23 }
  0xae   : > { %982 = vst [vmem:[%s1395_s14] sm:$0xff] %v981_v27   ;;  %v555_v57 = vunpack.c.l.bf16 %v491_v48 }
  0xaf   : > { %1061 = vst [vmem:[%s1395_s14 + $0x20] sm:$0xff] %v1001_v28   ;;  %v499_v28 = vpack.c.bf16 %v1389_v26, %v1389_v26  ;;  %v562_v26 = vunpack.c.l.bf16 %v498_v22 }
  0xb0   : > { %v625_v62 = vmul.f32 %v555_v57, %v555_v57  ;;  %v586_v3 = vadd.f32 %v555_v57, %v554_v59 }
  0xb2   : > { %v1399_v30 = vpop.f32.mrf.mxu2  ;;  %v1405_v34 = vpop.f32.mrf.mxu3  ;;  %v656_v11 = vadd.f32 %v625_v62, %v624_v0 }
  0xb3   : > { %v415_v31 = vpop.f32.mrf.mxu0  ;;  %v1401_v32 = vpop.f32.mrf.mxu1  ;;  %v1021_v33 = vpack.c.bf16 %v1399_v30, %v1387_v24  ;;  %v1041_v35 = vpack.c.bf16 %v1405_v34, %v1393_v29 }
  0xb4   : > { %v492_v51 = vpack.c.bf16 %v415_v31, %v415_v31 }
  0xb5   : > { %1065 = vst [vmem:[%s1395_s14 + $0x40] sm:$0xff] %v1021_v33  }
  0xb6   : > { %1069 = vst [vmem:[%s1395_s14 + $0x60] sm:$0xff] %v1041_v35   ;;  %v556_v60 = vunpack.c.l.bf16 %v492_v51 }
  0xb8   : > { %v626_v4 = vmul.f32 %v556_v60, %v556_v60  ;;  %v587_v12 = vadd.f32 %v586_v3, %v556_v60 }
  0xba   : > { %v1411_v36 = vpop.f32.mrf.mxu2  ;;  %v1417_v41 = vpop.f32.mrf.mxu3  ;;  %v657_v16 = vadd.f32 %v656_v11, %v626_v4 }
  0xbb   : > { %v417_v37 = vpop.f32.mrf.mxu0  ;;  %v1413_v38 = vpop.f32.mrf.mxu1 }
  0xbc   : > { %v986_v39 = vpack.c.bf16 %v417_v37, %v415_v31  ;;  %v1006_v40 = vpack.c.bf16 %v1413_v38, %v1401_v32  ;;  %v493_v58 = vpack.c.bf16 %v417_v37, %v417_v37 }
  0xbe   : > { %1058 = vst [vmem:[%s1395_s14 + $0x8] sm:$0xff] %v986_v39   ;;  %v557_v63 = vunpack.c.l.bf16 %v493_v58 }
  0xbf   : > { %1062 = vst [vmem:[%s1395_s14 + $0x28] sm:$0xff] %v1006_v40  }
  0xc0   : > { %v627_v13 = vmul.f32 %v557_v63, %v557_v63  ;;  %v588_v17 = vadd.f32 %v587_v12, %v557_v63 }
  0xc2   : > { %v1421_v42 = vpop.f32.mrf.mxu2  ;;  %v1427_v46 = vpop.f32.mrf.mxu3  ;;  %v658_v20 = vadd.f32 %v657_v16, %v627_v13 }
  0xc3   : > { %v420_v43 = vpop.f32.mrf.mxu0  ;;  %v1423_v44 = vpop.f32.mrf.mxu1  ;;  %v1026_v45 = vpack.c.bf16 %v1421_v42, %v1411_v36  ;;  %v1046_v47 = vpack.c.bf16 %v1427_v46, %v1417_v41 }
  0xc4   : > { %v494_v61 = vpack.c.bf16 %v420_v43, %v420_v43  ;;  %v502_v60 = vpack.c.bf16 %v1423_v44, %v1423_v44 }
  0xc5   : > { %1066 = vst [vmem:[%s1395_s14 + $0x48] sm:$0xff] %v1026_v45  }
  0xc6   : > { %1070 = vst [vmem:[%s1395_s14 + $0x68] sm:$0xff] %v1046_v47   ;;  %v558_v5 = vunpack.c.l.bf16 %v494_v61  ;;  %v500_v47 = vpack.c.bf16 %v1401_v32, %v1401_v32  ;;  %v632_v32 = vmul.f32 %v562_v26, %v562_v26 }
  0xc8   : > { %v628_v18 = vmul.f32 %v558_v5, %v558_v5  ;;  %v589_v21 = vadd.f32 %v588_v17, %v558_v5  ;;  %v564_v59 = vunpack.c.l.bf16 %v500_v47 }
  0xca   : > { %v1433_v50 = vpop.f32.mrf.mxu2  ;;  %v1439_v56 = vpop.f32.mrf.mxu3  ;;  %v659_v31 = vadd.f32 %v658_v20, %v628_v18 }
  0xcb   : > { %v422_v52 = vpop.f32.mrf.mxu0  ;;  %v1435_v53 = vpop.f32.mrf.mxu1 }
  0xcc   : > { %v991_v54 = vpack.c.bf16 %v422_v52, %v420_v43  ;;  %v1011_v55 = vpack.c.bf16 %v1435_v53, %v1423_v44  ;;  %v495_v1 = vpack.c.bf16 %v422_v52, %v422_v52  ;;  %v501_v52 = vpack.c.bf16 %v1413_v38, %v1413_v38 }
  0xcd   : > { %v503_v3 = vpack.c.bf16 %v1435_v53, %v1435_v53  ;;  %v634_v44 = vmul.f32 %v564_v59, %v564_v59 }
  0xce   : > { %1059 = vst [vmem:[%s1395_s14 + $0x10] sm:$0xff] %v991_v54   ;;  %v559_v15 = vunpack.c.l.bf16 %v495_v1  ;;  %v563_v54 = vunpack.c.l.bf16 %v499_v28  ;;  %v565_v0 = vunpack.c.l.bf16 %v501_v52 }
  0xcf   : > { %1063 = vst [vmem:[%s1395_s14 + $0x30] sm:$0xff] %v1011_v55  }
  0xd0   : > { %v629_v25 = vmul.f32 %v559_v15, %v559_v15  ;;  %v590_v33 = vadd.f32 %v589_v21, %v559_v15  ;;  %v633_v1 = vmul.f32 %v563_v54, %v563_v54  ;;  %v635_v13 = vmul.f32 %v565_v0, %v565_v0 }
  0xd2   : > { %v1443_v2 = vpop.f32.mrf.mxu2  ;;  %v1449_v10 = vpop.f32.mrf.mxu3  ;;  %v660_v48 = vadd.f32 %v659_v31, %v629_v25 }
  0xd3   : > { %v425_v6 = vpop.f32.mrf.mxu0  ;;  %v1445_v7 = vpop.f32.mrf.mxu1  ;;  %v1031_v8 = vpack.c.bf16 %v1443_v2, %v1433_v50  ;;  %v1051_v14 = vpack.c.bf16 %v1449_v10, %v1439_v56 }
  0xd4   : > { %v496_v9 = vpack.c.bf16 %v425_v6, %v425_v6  ;;  %v504_v53 = vpack.c.bf16 %v1445_v7, %v1445_v7 }
  0xd5   : > { %1067 = vst [vmem:[%s1395_s14 + $0x50] sm:$0xff] %v1031_v8  }
  0xd6   : > { %1071 = vst [vmem:[%s1395_s14 + $0x70] sm:$0xff] %v1051_v14   ;;  %v560_v19 = vunpack.c.l.bf16 %v496_v9  ;;  %v566_v9 = vunpack.c.l.bf16 %v502_v60  ;;  %v567_v14 = vunpack.c.l.bf16 %v503_v3 }
  0xd8   : > { %v630_v39 = vmul.f32 %v560_v19, %v560_v19  ;;  %v591_v49 = vadd.f32 %v590_v33, %v560_v19 }
  0xda   : > { %v1457_v27 = vpop.f32.mrf.mxu2  ;;  %v1466_v45 = vpop.f32.mrf.mxu3  ;;  %v661_v55 = vadd.f32 %v660_v48, %v630_v39 }
  0xdb   : > { %v427_v35 = vpop.f32.mrf.mxu0  ;;  %v1461_v37 = vpop.f32.mrf.mxu1 }
  0xdc   : > { %v497_v40 = vpack.c.bf16 %v427_v35, %v427_v35  ;;  %v996_v43 = vpack.c.bf16 %v427_v35, %v425_v6  ;;  %v1016_v23 = vpack.c.bf16 %v1461_v37, %v1445_v7  ;;  %v505_v17 = vpack.c.bf16 %v1461_v37, %v1461_v37 }
  0xde   : > { %1060 = vst [vmem:[%s1395_s14 + $0x18] sm:$0xff] %v996_v43   ;;  %v561_v51 = vunpack.c.l.bf16 %v497_v40 }
  0xdf   : > { %1064 = vst [vmem:[%s1395_s14 + $0x38] sm:$0xff] %v1016_v23  }
  0xe0   : > { %v592_v57 = vadd.f32 %v591_v49, %v561_v51  ;;  %v631_v58 = vmul.f32 %v561_v51, %v561_v51 }
  0xe2   : > { %v593_v61 = vadd.f32 %v592_v57, %v562_v26  ;;  %v662_v62 = vadd.f32 %v661_v55, %v631_v58  ;;  %v1480_v63 = vpop.f32.mrf.mxu2  ;;  %v1486_v6 = vpop.f32.mrf.mxu3 }
  0xe3   : > { %v1036_v38 = vpack.c.bf16 %v1480_v63, %v1457_v27  ;;  %v1056_v8 = vpack.c.bf16 %v1486_v6, %v1466_v45 }
  0xe4   : > { %v594_v4 = vadd.f32 %v593_v61, %v563_v54  ;;  %v663_v5 = vadd.f32 %v662_v62, %v632_v32 }
  0xe5   : > { %1068 = vst [vmem:[%s1395_s14 + $0x58] sm:$0xff] %v1036_v38  }
  0xe6   : > { %v595_v11 = vadd.f32 %v594_v4, %v564_v59  ;;  %v664_v12 = vadd.f32 %v663_v5, %v633_v1  ;;  %1072 = vst [vmem:[%s1395_s14 + $0x78] sm:$0xff] %v1056_v8  }
  0xe8   : > { %v665_v15 = vadd.f32 %v664_v12, %v634_v44  ;;  %v596_v16 = vadd.f32 %v595_v11, %v565_v0 }
  0xe9   : > { %1160 = shalt.err (!%p1157_p3)
}
  0xea   : > { %s1257_s14 = smov 64   ;;  %s1258_s22 = smov 4   ;;  %v506_v7 = vpack.c.bf16 %v1387_v24, %v1387_v24  ;;  %v636_v18 = vmul.f32 %v566_v9, %v566_v9  ;;  %v568_v19 = vunpack.c.l.bf16 %v504_v53  ;;  %v597_v20 = vadd.f32 %v596_v16, %v566_v9 }
  0xeb   : > { %1082 = dma.vmem_to_hbm [thread:$0]  (%p1324_p5), %s1488_s29, 2048, %s1490_s30, %s695_s5, %s1257_s14, %s1257_s14, %s1258_s22   ;;  %v666_v21 = vadd.f32 %v665_v15, %v635_v13  ;;  %v507_v22 = vpack.c.bf16 %v1399_v30, %v1399_v30  ;;  %v637_v25 = vmul.f32 %v567_v14, %v567_v14  ;;  %v569_v33 = vunpack.c.l.bf16 %v505_v17 }
  0xec   : > { %v598_v28 = vadd.f32 %v597_v20, %v567_v14  ;;  %v508_v35 = vpack.c.bf16 %v1411_v36, %v1411_v36  ;;  %v570_v37 = vunpack.c.l.bf16 %v506_v7  ;;  %v638_v40 = vmul.f32 %v568_v19, %v568_v19  ;;  %s729_s28 = scalar_lea.hbm %s1617_s3, %s1305_s19  ;;  %s699_s29 = sand.u32 1, %s1305_s19  }
  0xed   : > { %v667_v31 = vadd.f32 %v666_v21, %v636_v18  ;;  %v509_v24 = vpack.c.bf16 %v1421_v42, %v1421_v42  ;;  %v571_v23 = vunpack.c.l.bf16 %v507_v22  ;;  %v639_v48 = vmul.f32 %v569_v33, %v569_v33  ;;  %s742_s6 = scalar_lea.hbm %s1618_s4, %s1305_s19  ;;  %s201_s7 = scalar_lea.vmem [#allocation4], %s1384_s12 }
  0xee   : > { %v599_v39 = vadd.f32 %v598_v28, %v568_v19  ;;  %v572_v49 = vunpack.c.l.bf16 %v508_v35  ;;  %v640_v30 = vmul.f32 %v570_v37, %v570_v37  ;;  %v510_v51 = vpack.c.bf16 %v1433_v50, %v1433_v50  ;;  %s1556_s8 = sshll.u32 %s201_s7, 4  ;;  %s1558_s9 = sshll.u32 %s729_s28, 4  ;;  %s732_s8 = int_to_ptr.vmem [resolvable:$true] %s1556_s8  ;;  %s734_s9 = int_to_ptr.hbm [resolvable:$true] %s1558_s9 }
  0xef   : > { %v668_v43 = vadd.f32 %v667_v31, %v637_v25  ;;  %v573_v55 = vunpack.c.l.bf16 %v509_v24  ;;  %v641_v36 = vmul.f32 %v571_v23, %v571_v23  ;;  %v511_v59 = vpack.c.bf16 %v1443_v2, %v1443_v2  ;;  %s207_s10 = scalar_lea.vmem [#allocation6], %s1384_s12  ;;  %s1563_s13 = sshll.u32 %s742_s6, 4  ;;  %s747_s13 = int_to_ptr.hbm [resolvable:$true] %s1563_s13 }
  0xf0   : > { %v600_v26 = vadd.f32 %v599_v39, %v569_v33  ;;  %v642_v32 = vmul.f32 %v572_v49, %v572_v49  ;;  %v574_v42 = vunpack.c.l.bf16 %v510_v51  ;;  %v512_v62 = vpack.c.bf16 %v1457_v27, %v1457_v27  ;;  %s1561_s11 = sshll.u32 %s207_s10, 4  ;;  %s700_s19 = scalar_lea.sflag [#allocation5], %s699_s29  ;;  %s745_s11 = int_to_ptr.vmem [resolvable:$true] %s1561_s11 }
  0xf1   : > { %v669_v47 = vadd.f32 %v668_v43, %v638_v40  ;;  %v643_v0 = vmul.f32 %v573_v55, %v573_v55  ;;  %v575_v1 = vunpack.c.l.bf16 %v511_v59  ;;  %v513_v3 = vpack.c.bf16 %v1480_v63, %v1480_v63  ;;  %s1175_s14 = sshra.s32 %s734_s9, 4  ;;  %s1181_s27 = scalar_lea.hbm %s1617_s3, 2  ;;  %s1176_s14 = int_to_ptr.hbm [resolvable:$true] %s1175_s14 }
  0xf2   : > { %v601_v52 = vadd.f32 %v600_v26, %v570_v37  ;;  %v514_v4 = vpack.c.bf16 %v1393_v29, %v1393_v29  ;;  %v644_v5 = vmul.f32 %v574_v42, %v574_v42  ;;  %v576_v8 = vunpack.c.l.bf16 %v512_v62  ;;  %s1177_s22 = scalar_lea.hbm %s1176_s14, 1  ;;  %p1182_p9 = scmp.lt.s32.totalorder %s1176_s14, %s1617_s3 }
  0xf3   : > { %v670_v54 = vadd.f32 %v669_v47, %v639_v48  ;;  %v515_v9 = vpack.c.bf16 %v1405_v34, %v1405_v34  ;;  %v645_v12 = vmul.f32 %v575_v1, %v575_v1  ;;  %v577_v53 = vunpack.c.l.bf16 %v513_v3  ;;  %p1178_p4 = scmp.ne.s32.totalorder %s1176_s14, %s1177_s22  ;;  %p1183_p10 = scmp.lt.s32.totalorder %s1181_s27, %s1177_s22 }
  0xf4   : > { %v602_v57 = vadd.f32 %v601_v52, %v571_v23  ;;  %v516_v13 = vpack.c.bf16 %v1417_v41, %v1417_v41  ;;  %v578_v14 = vunpack.c.l.bf16 %v514_v4  ;;  %v646_v16 = vmul.f32 %v576_v8, %v576_v8 }
  0xf5   : > { %v671_v58 = vadd.f32 %v670_v54, %v640_v30  ;;  %v517_v29 = vpack.c.bf16 %v1427_v46, %v1427_v46  ;;  %v579_v17 = vunpack.c.l.bf16 %v515_v9  ;;  %v647_v19 = vmul.f32 %v577_v53, %v577_v53  ;;  %p1179_p7 = pnand %p1178_p4, %p1324_p5  ;;  %p1184_p11 = por %p1183_p10, %p1182_p9 }
  0xf6   : > { %v603_v60 = vadd.f32 %v602_v57, %v572_v49  ;;  %v580_v20 = vunpack.c.l.bf16 %v516_v13  ;;  %v648_v34 = vmul.f32 %v578_v14, %v578_v14  ;;  %v518_v21 = vpack.c.bf16 %v1439_v56, %v1439_v56 }
  0xf7   : > { %v672_v61 = vadd.f32 %v671_v58, %v641_v36  ;;  %v581_v28 = vunpack.c.l.bf16 %v517_v29  ;;  %v649_v41 = vmul.f32 %v579_v17, %v579_v17  ;;  %v519_v35 = vpack.c.bf16 %v1449_v10, %v1449_v10  ;;  %p1180_p8 = pneg %p1179_p7 }
  0xf8   : > { %v604_v50 = vadd.f32 %v603_v60, %v573_v55  ;;  %v650_v37 = vmul.f32 %v580_v20, %v580_v20  ;;  %v582_v46 = vunpack.c.l.bf16 %v518_v21  ;;  %v520_v43 = vpack.c.bf16 %v1466_v45, %v1466_v45 }
  0xf9   : > { %v673_v38 = vadd.f32 %v672_v61, %v642_v32  ;;  %v651_v24 = vmul.f32 %v581_v28, %v581_v28  ;;  %v583_v47 = vunpack.c.l.bf16 %v519_v35  ;;  %v521_v26 = vpack.c.bf16 %v1486_v6, %v1486_v6  ;;  %p1185_p12 = pnand %p1184_p11, %p1180_p8 }
  0xfa   : > { %v605_v44 = vadd.f32 %v604_v50, %v574_v42  ;;  %v652_v48 = vmul.f32 %v582_v46, %v582_v46  ;;  %v584_v51 = vunpack.c.l.bf16 %v520_v43 }
  0xfb   : > { %v674_v2 = vadd.f32 %v673_v38, %v643_v0  ;;  %v653_v10 = vmul.f32 %v583_v47, %v583_v47  ;;  %v585_v55 = vunpack.c.l.bf16 %v521_v26 }
  0xfc   : > { %v606_v11 = vadd.f32 %v605_v44, %v575_v1  ;;  %v654_v57 = vmul.f32 %v584_v51, %v584_v51 }
  0xfd   : > { %v675_v27 = vadd.f32 %v674_v2, %v644_v5  ;;  %v655_v32 = vmul.f32 %v585_v55, %v585_v55 }
  0xfe   : > { %v607_v63 = vadd.f32 %v606_v11, %v576_v8 }
  0xff   : > { %v676_v15 = vadd.f32 %v675_v27, %v645_v12 }
 0x100   : > { %v608_v18 = vadd.f32 %v607_v63, %v577_v53 }
 0x101   : > { %v677_v7 = vadd.f32 %v676_v15, %v646_v16 }
 0x102   : > { %v609_v22 = vadd.f32 %v608_v18, %v578_v14 }
 0x103   : > { %v678_v25 = vadd.f32 %v677_v7, %v647_v19 }
 0x104   : > { %v610_v31 = vadd.f32 %v609_v22, %v579_v17 }
 0x105   : > { %v679_v33 = vadd.f32 %v678_v25, %v648_v34 }
 0x106   : > { %v611_v39 = vadd.f32 %v610_v31, %v580_v20 }
 0x107   : > { %v680_v40 = vadd.f32 %v679_v33, %v649_v41 }
 0x108   : > { %v612_v56 = vadd.f32 %v611_v39, %v581_v28 }
 0x109   : > { %v681_v23 = vadd.f32 %v680_v40, %v650_v37 }
 0x10a   : > { %v613_v49 = vadd.f32 %v612_v56, %v582_v46 }
 0x10b   : > { %v682_v30 = vadd.f32 %v681_v23, %v651_v24 }
 0x10c   : > { %v614_v52 = vadd.f32 %v613_v49, %v583_v47 }
 0x10d   : > { %v683_v54 = vadd.f32 %v682_v30, %v652_v48 }
 0x10e   : > { %v615_v45 = vadd.f32 %v614_v52, %v584_v51 }
 0x10f   : > { %v684_v36 = vadd.f32 %v683_v54, %v653_v10 }
 0x110   : > { %v616_v59 = vadd.f32 %v615_v45, %v585_v55 }
 0x111   : > { %v685_v58 = vadd.f32 %v684_v36, %v654_v57 }
 0x112   : > { %v617_v42 = vrot.slane %v616_v59, 4 }
 0x113   : > { %v686_v6 = vadd.f32 %v685_v58, %v655_v32 }
 0x114   : > { %v618_v60 = vadd.f32 %v617_v42, %v616_v59 }
 0x115   : > { %v687_v61 = vrot.slane %v686_v6, 4 }
 0x116   : > { %v619_v62 = vrot.slane %v618_v60, 2 }
 0x117   : > { %v688_v0 = vadd.f32 %v687_v61, %v686_v6 }
 0x118   : > { %v620_v38 = vadd.f32 %v619_v62, %v618_v60 }
 0x119   : > { %v689_v1 = vrot.slane %v688_v0, 2 }
 0x11a   : > { %v621_v3 = vrot.slane %v620_v38, 1 }
 0x11b   : > { %v690_v50 = vadd.f32 %v689_v1, %v688_v0 }
 0x11c   : > { %v622_v4 = vadd.f32 %v621_v3, %v620_v38 }
 0x11d   : > { %v691_v5 = vrot.slane %v690_v50, 1 }
 0x11e   : > { %623 = vst [vmem:[%s201_s7] sm:$0x1] %v622_v4 }
 0x11f   : > { %v692_v44 = vadd.f32 %v691_v5, %v690_v50 }
 0x120   : > { %1188 = shalt.err (!%p1185_p12)
}
 0x121   : > { %1083 = dma.vmem_to_hbm [thread:$0]  (%p1324_p5), %s732_s8, 16, %s734_s9, %s700_s19   ;;  %693 = vst [vmem:[%s207_s10] sm:$0x1] %v692_v44 }
 0x122   : > { %s1203_s29 = sshra.s32 %s747_s13, 4  ;;  %s1209_s14 = scalar_lea.hbm %s1618_s4, 2  ;;  %s1204_s29 = int_to_ptr.hbm [resolvable:$true] %s1203_s29 }
 0x123   : > { %s1205_s5 = scalar_lea.hbm %s1204_s29, 1  ;;  %p1210_p2 = scmp.lt.s32.totalorder %s1204_s29, %s1618_s4 }
 0x124   : > { %p1206_p13 = scmp.ne.s32.totalorder %s1204_s29, %s1205_s5  ;;  %p1211_p3 = scmp.lt.s32.totalorder %s1209_s14, %s1205_s5 }
 0x126   : > { %p1207_p0 = pnand %p1206_p13, %p1324_p5  ;;  %p1212_p4 = por %p1211_p3, %p1210_p2 }
 0x128   : > { %p1208_p1 = pneg %p1207_p0 }
 0x12a   : > { %p1213_p7 = pnand %p1212_p4, %p1208_p1 }
 0x12c   : > { %1216 = shalt.err (!%p1213_p7)
}
 0x12d   : > { %1084 = dma.vmem_to_hbm [thread:$0]  (%p1324_p5), %s745_s11, 16, %s747_s13, %s700_s19  }
 0x12e PF: > { %p1098_p8 = scmp.ge.s32.totalorder %s1255_s18, 2  ;;  %s758_s8 = sand.u32 1, %s1243_s15  }
 0x12f   : > { %s759_s9 = scalar_lea.sflag [#allocation3], %s758_s8 }
 0x130   : > { %p1089_p9 = pnand %p1098_p8, %p1328_p6 }
 0x132   : > { %p1090_p10 = pneg %p1089_p9 }
 0x134   : > { %1234 = dma.done.wait (%p1090_p10), %s759_s9, 2048  }
 0x135   : > { %1236 = vsyncadd (%p1090_p10), %s759_s9, 4294965248  ;;  %s768_s25 = sand.u32 1, %s859_s20  }
 0x136   : > { %s769_s10 = scalar_lea.sflag [#allocation5], %s768_s25 }
 0x137   : > { %1238 = dma.done.wait (%p1090_p10), %s769_s10, 32  }
 0x138   : > { %1240 = vsyncadd (%p1090_p10), %s769_s10, 4294967264  ;;  %p18_p5 = scmp.ge.s32.totalorder %s1309_s21, 4   ;;  %s1621_s15 = smov %s1247_s16 }
 0x139   : > { %s1622_s16 = smov %s1251_s17  ;;  %s1623_s17 = smov %s1322_s24 }
 0x13a   : > { %s1624_s18 = smov %s1309_s21  ;;  %20 = sbr.rel (!%p18_p5) target bundleno = 5 (0x5), region = 95 }
 0x13f   :  { %783 = vsyncpa [#allocation3], 1 }
 0x140   :  { %785 = vsyncpa [#allocation3 + $0x1], 1 }
 0x141   :  { %786 = vsyncpa [#allocation5], 1 }
 0x142   :  { %788 = vsyncpa [#allocation5 + $0x1], 1 }

</bundles_post_ra>
